<compile_context>
chip_gen: v6e
topology: v6e:2x2x1
jax: 0.10.0
libtpu: 0.0.40
codegen_flags: <defaults>
</compile_context>

<pallas_src>
import functools

import jax
import jax.numpy as jnp
from jax.experimental import pallas as pl
from jax.experimental.pallas import tpu as pltpu


# --------------------------------------------------------------------------------------
# Kernel
# --------------------------------------------------------------------------------------
def _sdpa_kernel(scale_ref, *refs, has_bias, has_kpm, want_scores):
    # refs = [q, k, v, (bias), (kpm_bias), out, attn, (scores)]
    it = iter(refs)
    q_ref = next(it)                            # (Bt, q_blk, d_k)
    k_ref = next(it)                            # (Bt, d_k, seq_len)
    v_ref = next(it)                            # (Bt, seq_len, d_v)
    bias_ref = next(it) if has_bias else None   # (Bt|1, q_blk, seq_len) additive
    kpm_ref = next(it) if has_kpm else None     # (Bt, 1, seq_len) additive (0 / -inf)
    out_ref = next(it)                          # (Bt, q_blk, d_v)
    attn_ref = next(it)                         # (Bt, q_blk, seq_len)
    scores_ref = next(it) if want_scores else None

    scale = scale_ref[0]

    q = q_ref[...]
    k = k_ref[...]
    v = v_ref[...]

    # scores = (q @ k) * scale (+ additive bias / masks); MXU batched matmul, f32 accum.
    s = jnp.einsum("bqd,bds->bqs", q, k,
                   preferred_element_type=jnp.float32) * scale
    if bias_ref is not None:
        s = s + bias_ref[...].astype(jnp.float32)   # broadcasts (1,qb,s) when shared
    if kpm_ref is not None:
        s = s + kpm_ref[...].astype(jnp.float32)    # broadcasts over the q rows

    if scores_ref is not None:
        scores_ref[...] = s.astype(scores_ref.dtype)

    # Row-wise numerically-stable softmax over seq_len (seq_len kept whole per block,
    # so no online softmax is required).  Fully-masked rows produce NaN, matching
    # torch.softmax semantics.
    m = jnp.max(s, axis=-1, keepdims=True)
    e = jnp.exp(s - m)
    denom = jnp.sum(e, axis=-1, keepdims=True)
    attn = e * pl.reciprocal(denom, approx=True)     # EUP vrcp; rows sum to 1 within ~1e-3
    attn_ref[...] = attn.astype(attn_ref.dtype)

    # output = attn @ v -- native (possibly bf16) dtype on the MXU path, f32 accum.
    out_ref[...] = jnp.einsum("bqs,bsd->bqd", attn.astype(v.dtype), v,
                              preferred_element_type=jnp.float32).astype(out_ref.dtype)


# --------------------------------------------------------------------------------------
# Generation-aware budgets / tiling
# --------------------------------------------------------------------------------------
@functools.lru_cache(maxsize=1)
def _vmem_limit_bytes():
    """Scoped-VMEM limit: ~3/4 of physical VMEM, capped at 100 MiB.

    v7x: 64 MiB physical -> 48 MiB limit.   v5e/v6e: 128 MiB -> 96 MiB limit.
    Falls back to the v7x-safe value if the query is unavailable.
    """
    phys = 64 * 1024 * 1024
    try:
        info = pltpu.get_tpu_info()
        cap = getattr(info, "vmem_capacity_bytes", None)
        if cap:
            phys = int(cap)
    except Exception:
        pass
    return min((phys * 3) // 4, 100 * 1024 * 1024)


def _divisors_desc(n):
    return [d for d in range(n, 0, -1) if n % d == 0]


def _choose_tiles(B, q_len, per_step_bytes, target_bytes, vmem_limit_bytes,
                  q_align, q_pref_cap=512):
    """Pick (heads-per-block bt, q rows-per-block q_blk).

    Policy (per perf review): grow q_blk — the MXU M dimension — first (up to
    `q_pref_cap`, keeping the systolic array streaming), then spend the leftover
    per-step byte budget on bt, which only amortizes DMA/step overhead.
    """
    valid_q = [d for d in _divisors_desc(q_len) if d == q_len or d % q_align == 0]
    if not valid_q:
        valid_q = [q_len]
    min_q = valid_q[-1]

    # Guard: even the minimal single-head tile (plus double-buffering) must fit VMEM.
    if 2 * per_step_bytes(1, min_q) > vmem_limit_bytes:
        raise ValueError(
            "scaled_dot_product_attention: seq_len too long for the single-pass "
            "softmax kernel (minimal tile exceeds the VMEM budget). A flash-style "
            "seq-tiled online-softmax path is required for this shape.")

    # 1) largest q_blk <= q_pref_cap that fits the budget with a single head.
    q_blk = None
    for d in valid_q:
        if d <= q_pref_cap and per_step_bytes(1, d) <= target_bytes:
            q_blk = d
            break
    if q_blk is None:
        for d in valid_q:
            if per_step_bytes(1, d) <= target_bytes:
                q_blk = d
                break
    if q_blk is None:
        q_blk = min_q   # over the soft target but under the hard VMEM guard above

    # 2) spend leftover budget on heads-per-block.
    bt = 1
    for d in _divisors_desc(B):
        if per_step_bytes(d, q_blk) <= target_bytes:
            bt = d
            break
    return bt, q_blk


# --------------------------------------------------------------------------------------
# Wrapper
# --------------------------------------------------------------------------------------
@functools.partial(jax.jit,
                   static_argnames=("res_attention", "attn_dtype", "compute_dtype"))
def scaled_dot_product_attention(q, k, v, scale, prev=None,
                                 key_padding_mask=None, attn_mask=None,
                                 res_attention=False, attn_dtype=None,
                                 compute_dtype=None):
    """JAX/Pallas equivalent of _ScaledDotProductAttention.forward.

    q: [bs, n_heads, q_len, d_k]    k: [bs, n_heads, d_k, seq_len]
    v: [bs, n_heads, seq_len, d_v]  prev: [bs, n_heads, q_len, seq_len] or None
    key_padding_mask: [bs, seq_len] bool or None
    attn_mask: [1, q_len, seq_len] (bool or additive) or None
    attn_dtype: optional dtype for the attn/scores outputs (e.g. bf16 to halve HBM writeback)
    compute_dtype: optional dtype for the MXU inputs (e.g. bf16); accumulation stays f32
    """
    bs, n_heads, q_len, d_k = q.shape
    seq_len = k.shape[-1]
    d_v = v.shape[-1]
    B = bs * n_heads

    score_dt = jnp.result_type(q.dtype, k.dtype) if attn_dtype is None else attn_dtype
    out_dt = jnp.result_type(q.dtype, k.dtype, v.dtype)

    qf = q.reshape(B, q_len, d_k)
    kf = k.reshape(B, d_k, seq_len)
    vf = v.reshape(B, seq_len, d_v)
    if compute_dtype is not None:
        qf = qf.astype(compute_dtype)
        kf = kf.astype(compute_dtype)
        vf = vf.astype(compute_dtype)

    # ---- fold prev / masks into the *smallest* additive bias representation ----
    am = None
    if attn_mask is not None:
        am = attn_mask
        while am.ndim > 2:            # [1, q_len, seq_len] -> [q_len, seq_len]
            am = am[0]

    bias = None                        # (B, q_len, seq_len) per-head, or (1, ..) shared
    bias_is_shared = False
    kpm_bias = None                    # (B, 1, seq_len) additive 0 / -inf

    if prev is not None:
        # prev stays in its native dtype in HBM (bf16 prev halves the largest bias read
        # stream); bool masks fold exactly (-inf representable in bf16/f32).
        bias = prev.reshape(B, q_len, seq_len)
        neg_inf_b = jnp.asarray(-jnp.inf, dtype=bias.dtype)
        if am is not None:
            if am.dtype == jnp.bool_:
                bias = jnp.where(am[None], neg_inf_b, bias)   # masked_fill_ semantics
            else:
                bias = bias + am.astype(bias.dtype)[None]
        if key_padding_mask is not None:
            kpm_b = jnp.broadcast_to(
                key_padding_mask[:, None, None, :],
                (bs, n_heads, 1, seq_len)).reshape(B, 1, seq_len)
            bias = jnp.where(kpm_b, neg_inf_b, bias)
            key_padding_mask = None    # folded
    elif am is not None:
        # attn_mask is shared across batch/heads -> single (1, q_len, seq_len) block.
        bias_is_shared = True
        if am.dtype == jnp.bool_:
            bias = jnp.where(am, jnp.float32(-jnp.inf), jnp.float32(0.0))[None]
        else:
            bias = am.astype(jnp.float32)[None]

    if key_padding_mask is not None:
        # q_len-independent row mask: only (B, 1, seq_len) of traffic.
        kpm_bias = jnp.where(key_padding_mask, jnp.float32(-jnp.inf), jnp.float32(0.0))
        kpm_bias = jnp.broadcast_to(
            kpm_bias[:, None, None, :],
            (bs, n_heads, 1, seq_len)).reshape(B, 1, seq_len)

    # ---- generation-aware budgets & tiling ----
    vmem_limit = _vmem_limit_bytes()
    target_bytes = max(vmem_limit // 6, 2 * 1024 * 1024)   # ~8 MiB (v7x) / ~16 MiB (v5e/v6e)

    qkv_isz = qf.dtype.itemsize
    attn_isz = jnp.dtype(score_dt).itemsize
    out_isz = jnp.dtype(out_dt).itemsize
    bias_isz = bias.dtype.itemsize if bias is not None else 0
    n_attn_streams = 2 if res_attention else 1

    def per_step_bytes(bt, qb):
        b = bt * qb * d_k * qkv_isz                      # q block in
        b += bt * d_k * seq_len * qkv_isz                # k block in
        b += bt * seq_len * d_v * qkv_isz                # v block in
        if bias is not None:
            bb = 1 if bias_is_shared else bt
            b += bb * qb * seq_len * bias_isz            # additive bias in
        if kpm_bias is not None:
            b += bt * seq_len * 4                        # row mask in
        b += bt * qb * d_v * out_isz                     # out
        b += n_attn_streams * bt * qb * seq_len * attn_isz   # attn (+ scores)
        b += 2 * bt * qb * seq_len * 4                   # f32 s / e intermediates
        return b

    q_align = 8 * max(1, 4 // qkv_isz)                   # 8 (f32) / 16 (bf16) / 32 (i8)
    bt, q_blk = _choose_tiles(B, q_len, per_step_bytes, target_bytes,
                              vmem_limit, q_align)
    grid = (B // bt, q_len // q_blk)

    in_specs = [
        pl.BlockSpec((bt, q_blk, d_k), lambda b, i, s: (b, i, 0)),
        pl.BlockSpec((bt, d_k, seq_len), lambda b, i, s: (b, 0, 0)),
        pl.BlockSpec((bt, seq_len, d_v), lambda b, i, s: (b, 0, 0)),
    ]
    inputs = [qf, kf, vf]
    if bias is not None:
        if bias_is_shared:
            in_specs.append(
                pl.BlockSpec((1, q_blk, seq_len), lambda b, i, s: (0, i, 0)))
        else:
            in_specs.append(
                pl.BlockSpec((bt, q_blk, seq_len), lambda b, i, s: (b, i, 0)))
        inputs.append(bias)
    if kpm_bias is not None:
        in_specs.append(
            pl.BlockSpec((bt, 1, seq_len), lambda b, i, s: (b, 0, 0)))
        inputs.append(kpm_bias)

    out_specs = [
        pl.BlockSpec((bt, q_blk, d_v), lambda b, i, s: (b, i, 0)),
        pl.BlockSpec((bt, q_blk, seq_len), lambda b, i, s: (b, i, 0)),
    ]
    out_shapes = [
        jax.ShapeDtypeStruct((B, q_len, d_v), out_dt),
        jax.ShapeDtypeStruct((B, q_len, seq_len), score_dt),
    ]
    if res_attention:
        out_specs.append(
            pl.BlockSpec((bt, q_blk, seq_len), lambda b, i, s: (b, i, 0)))
        out_shapes.append(jax.ShapeDtypeStruct((B, q_len, seq_len), score_dt))

    kernel = functools.partial(
        _sdpa_kernel,
        has_bias=bias is not None,
        has_kpm=kpm_bias is not None,
        want_scores=res_attention,
    )

    scale_arr = jnp.asarray(scale, dtype=jnp.float32).reshape(1)

    grid_spec = pltpu.PrefetchScalarGridSpec(
        num_scalar_prefetch=1,            # scale lives in SMEM
        grid=grid,
        in_specs=in_specs,
        out_specs=out_specs,
    )

    results = pl.pallas_call(
        kernel,
        out_shape=tuple(out_shapes),
        grid_spec=grid_spec,
        compiler_params=pltpu.CompilerParams(
            # Megacore (v7x) shards the head/batch axis; the q axis stays a sequential
            # inner loop per core so the K/V blocks (index_map (b,0,0)) remain resident.
            dimension_semantics=("parallel", "arbitrary"),
            vmem_limit_bytes=vmem_limit,
        ),
    )(scale_arr, *inputs)

    out = results[0].reshape(bs, n_heads, q_len, d_v)
    attn = results[1].reshape(bs, n_heads, q_len, seq_len)
    if res_attention:
        scores = results[2].reshape(bs, n_heads, q_len, seq_len)
        return out, attn, scores
    return out, attn


# --------------------------------------------------------------------------------------
# Self-test
# --------------------------------------------------------------------------------------
if __name__ == "__main__":
    # module config: d_model=32, n_heads=4 -> head_dim=8, scale=head_dim**-0.5 (lsa=False)
    d_model, n_heads = 32, 4
    head_dim = d_model // n_heads
    scale = head_dim ** (-0.5)

    bs, q_len, seq_len, d_k, d_v = 2, 8, 8, head_dim, head_dim

    key = jax.random.PRNGKey(0)
    kq, kk, kv, kp = jax.random.split(key, 4)
    q = jax.random.normal(kq, (bs, n_heads, q_len, d_k), dtype=jnp.float32)
    k = jax.random.normal(kk, (bs, n_heads, d_k, seq_len), dtype=jnp.float32)
    v = jax.random.normal(kv, (bs, n_heads, seq_len, d_v), dtype=jnp.float32)
    prev = 0.1 * jax.random.normal(kp, (bs, n_heads, q_len, seq_len), dtype=jnp.float32)

    # --- path 1: residual attention (prev) + scores returned ---
    out, attn, scores = scaled_dot_product_attention(
        q, k, v, scale, prev=prev, res_attention=True)
    jax.block_until_ready((out, attn, scores))

    ref_scores = jnp.einsum("bhqd,bhds->bhqs", q, k) * scale + prev
    ref_attn = jax.nn.softmax(ref_scores, axis=-1)
    ref_out = jnp.einsum("bhqs,bhsd->bhqd", ref_attn, v)
    assert jnp.allclose(scores, ref_scores, atol=1e-4, rtol=1e-4)
    # approx reciprocal (EUP vrcp): attn rows sum to 1 within ~1e-3.
    assert jnp.allclose(attn, ref_attn, atol=3e-3, rtol=3e-3)
    assert jnp.allclose(out, ref_out, atol=3e-3, rtol=3e-3)

    # --- path 2: boolean attn_mask + key_padding_mask, no prev, no scores output ---
    causal = jnp.triu(jnp.ones((q_len, seq_len), dtype=jnp.bool_), k=1)[None]  # [1,q,s]
    kpm = jnp.zeros((bs, seq_len), dtype=jnp.bool_).at[1, -1].set(True)
    out2, attn2 = scaled_dot_product_attention(
        q, k, v, scale, key_padding_mask=kpm, attn_mask=causal, res_attention=False)
    jax.block_until_ready((out2, attn2))

    ref_s2 = jnp.einsum("bhqd,bhds->bhqs", q, k) * scale
    ref_s2 = jnp.where(causal[None], -jnp.inf, ref_s2)
    ref_s2 = jnp.where(kpm[:, None, None, :], -jnp.inf, ref_s2)
    ref_a2 = jax.nn.softmax(ref_s2, axis=-1)
    ref_o2 = jnp.einsum("bhqs,bhsd->bhqd", ref_a2, v)
    assert jnp.allclose(attn2, ref_a2, atol=3e-3, rtol=3e-3)
    assert jnp.allclose(out2, ref_o2, atol=3e-3, rtol=3e-3)

    print("KERNEL_OK")
</pallas_src>

<mosaic_0001>
module attributes {stable_mosaic.version = 11 : i64} {
  func.func @_sdpa_kernel(%arg0: i32, %arg1: i32, %arg2: memref<1xf32, #tpu.memory_space<smem>>, %arg3: memref<8x8x8xf32, #tpu.memory_space<vmem>>, %arg4: memref<8x8x8xf32, #tpu.memory_space<vmem>>, %arg5: memref<8x8x8xf32, #tpu.memory_space<vmem>>, %arg6: memref<8x8x8xf32, #tpu.memory_space<vmem>>, %arg7: memref<8x8x8xf32, #tpu.memory_space<vmem>>, %arg8: memref<8x8x8xf32, #tpu.memory_space<vmem>>, %arg9: memref<8x8x8xf32, #tpu.memory_space<vmem>>) attributes {dimension_semantics = [#tpu.dimension_semantics<parallel>, #tpu.dimension_semantics<arbitrary>], iteration_bounds = array<i64: 1, 1>, scalar_prefetch = 1 : i64, scratch_operands = 0 : i64, tpu.core_type = #tpu.core_type<tc>, window_params = [{transform_indices = @transform_0, window_bounds = array<i64: 8, 8, 8>}, {transform_indices = @transform_1, window_bounds = array<i64: 8, 8, 8>}, {transform_indices = @transform_2, window_bounds = array<i64: 8, 8, 8>}, {transform_indices = @transform_3, window_bounds = array<i64: 8, 8, 8>}, {transform_indices = @transform_4, window_bounds = array<i64: 8, 8, 8>}, {transform_indices = @transform_5, window_bounds = array<i64: 8, 8, 8>}, {transform_indices = @transform_6, window_bounds = array<i64: 8, 8, 8>}]} {
    %c0 = arith.constant 0 : index
    %0 = memref.load %arg2[%c0] : memref<1xf32, #tpu.memory_space<smem>>
    %c0_0 = arith.constant 0 : index
    %c0_1 = arith.constant 0 : index
    %c0_2 = arith.constant 0 : index
    %1 = vector.load %arg3[%c0_0, %c0_1, %c0_2] : memref<8x8x8xf32, #tpu.memory_space<vmem>>, vector<8x8x8xf32>
    %c0_3 = arith.constant 0 : index
    %c0_4 = arith.constant 0 : index
    %c0_5 = arith.constant 0 : index
    %2 = vector.load %arg4[%c0_3, %c0_4, %c0_5] : memref<8x8x8xf32, #tpu.memory_space<vmem>>, vector<8x8x8xf32>
    %c0_6 = arith.constant 0 : index
    %c0_7 = arith.constant 0 : index
    %c0_8 = arith.constant 0 : index
    %3 = vector.load %arg5[%c0_6, %c0_7, %c0_8] : memref<8x8x8xf32, #tpu.memory_space<vmem>>, vector<8x8x8xf32>
    "tpu.trace_start"() <{level = 10 : i32, message = "bqd,bds->bqs"}> : () -> ()
    %cst = arith.constant dense<0.000000e+00> : vector<8x8x8xf32>
    %4 = tpu.matmul %1, %2, %cst {dimension_numbers = #tpu.dot_dimension_numbers<[2], [1], [1], [2], [0, 0, 0, 1, 1, 2], [0], [0]>} : vector<8x8x8xf32>, vector<8x8x8xf32>, vector<8x8x8xf32> -> vector<8x8x8xf32>
    "tpu.trace_stop"() : () -> ()
    %5 = vector.broadcast %0 : f32 to vector<8x8x8xf32>
    %6 = arith.mulf %4, %5 : vector<8x8x8xf32>
    %c0_9 = arith.constant 0 : index
    %c0_10 = arith.constant 0 : index
    %c0_11 = arith.constant 0 : index
    %7 = vector.load %arg6[%c0_9, %c0_10, %c0_11] : memref<8x8x8xf32, #tpu.memory_space<vmem>>, vector<8x8x8xf32>
    %8 = arith.addf %6, %7 : vector<8x8x8xf32>
    %c0_12 = arith.constant 0 : index
    %c0_13 = arith.constant 0 : index
    %c0_14 = arith.constant 0 : index
    %9 = vector.load %arg9[%c0_12, %c0_13, %c0_14] : memref<8x8x8xf32, #tpu.memory_space<vmem>>, vector<8x8x8xf32>
    tpu.vector_store %arg9[%c0_12, %c0_13, %c0_14], %8 {strides = array<i32>} : memref<8x8x8xf32, #tpu.memory_space<vmem>>, vector<8x8x8xf32>,
    %cst_15 = arith.constant dense<0xFF800000> : vector<8x8xf32>
    %10 = vector.multi_reduction <maximumf>, %8, %cst_15 [2] : vector<8x8x8xf32> to vector<8x8xf32>
    %11 = vector.shape_cast %10 : vector<8x8xf32> to vector<8x8x1xf32>
    %12 = vector.broadcast %11 : vector<8x8x1xf32> to vector<8x8x8xf32>
    %13 = arith.subf %8, %12 : vector<8x8x8xf32>
    %14 = math.exp %13 : vector<8x8x8xf32>
    %cst_16 = arith.constant dense<0.000000e+00> : vector<8x8xf32>
    %15 = vector.multi_reduction <add>, %14, %cst_16 [2] : vector<8x8x8xf32> to vector<8x8xf32>
    %16 = vector.shape_cast %15 : vector<8x8xf32> to vector<8x8x1xf32>
    %17 = tpu.reciprocal %16 {approx = true} : vector<8x8x1xf32> -> vector<8x8x1xf32>
    %18 = vector.broadcast %17 : vector<8x8x1xf32> to vector<8x8x8xf32>
    %19 = arith.mulf %14, %18 : vector<8x8x8xf32>
    %c0_17 = arith.constant 0 : index
    %c0_18 = arith.constant 0 : index
    %c0_19 = arith.constant 0 : index
    %20 = vector.load %arg8[%c0_17, %c0_18, %c0_19] : memref<8x8x8xf32, #tpu.memory_space<vmem>>, vector<8x8x8xf32>
    tpu.vector_store %arg8[%c0_17, %c0_18, %c0_19], %19 {strides = array<i32>} : memref<8x8x8xf32, #tpu.memory_space<vmem>>, vector<8x8x8xf32>,
    "tpu.trace_start"() <{level = 10 : i32, message = "bqs,bsd->bqd"}> : () -> ()
    %cst_20 = arith.constant dense<0.000000e+00> : vector<8x8x8xf32>
    %21 = tpu.matmul %19, %3, %cst_20 {dimension_numbers = #tpu.dot_dimension_numbers<[2], [1], [1], [2], [0, 0, 0, 1, 1, 2], [0], [0]>} : vector<8x8x8xf32>, vector<8x8x8xf32>, vector<8x8x8xf32> -> vector<8x8x8xf32>
    "tpu.trace_stop"() : () -> ()
    %c0_21 = arith.constant 0 : index
    %c0_22 = arith.constant 0 : index
    %c0_23 = arith.constant 0 : index
    %22 = vector.load %arg7[%c0_21, %c0_22, %c0_23] : memref<8x8x8xf32, #tpu.memory_space<vmem>>, vector<8x8x8xf32>
    tpu.vector_store %arg7[%c0_21, %c0_22, %c0_23], %21 {strides = array<i32>} : memref<8x8x8xf32, #tpu.memory_space<vmem>>, vector<8x8x8xf32>,
    return
  }
  func.func @transform_0(%arg0: i32, %arg1: i32, %arg2: memref<1xf32, #tpu.memory_space<smem>>) -> (i32, i32, i32) {
    %c0_i32 = arith.constant 0 : i32
    %c0_i32_0 = arith.constant 0 : i32
    return %arg0, %arg1, %c0_i32 : i32, i32, i32
  }
  func.func @transform_1(%arg0: i32, %arg1: i32, %arg2: memref<1xf32, #tpu.memory_space<smem>>) -> (i32, i32, i32) {
    %c0_i32 = arith.constant 0 : i32
    %c0_i32_0 = arith.constant 0 : i32
    %c0_i32_1 = arith.constant 0 : i32
    return %arg0, %c0_i32, %c0_i32_0 : i32, i32, i32
  }
  func.func @transform_2(%arg0: i32, %arg1: i32, %arg2: memref<1xf32, #tpu.memory_space<smem>>) -> (i32, i32, i32) {
    %c0_i32 = arith.constant 0 : i32
    %c0_i32_0 = arith.constant 0 : i32
    %c0_i32_1 = arith.constant 0 : i32
    return %arg0, %c0_i32, %c0_i32_0 : i32, i32, i32
  }
  func.func @transform_3(%arg0: i32, %arg1: i32, %arg2: memref<1xf32, #tpu.memory_space<smem>>) -> (i32, i32, i32) {
    %c0_i32 = arith.constant 0 : i32
    %c0_i32_0 = arith.constant 0 : i32
    return %arg0, %arg1, %c0_i32 : i32, i32, i32
  }
  func.func @transform_4(%arg0: i32, %arg1: i32, %arg2: memref<1xf32, #tpu.memory_space<smem>>) -> (i32, i32, i32) {
    %c0_i32 = arith.constant 0 : i32
    %c0_i32_0 = arith.constant 0 : i32
    return %arg0, %arg1, %c0_i32 : i32, i32, i32
  }
  func.func @transform_5(%arg0: i32, %arg1: i32, %arg2: memref<1xf32, #tpu.memory_space<smem>>) -> (i32, i32, i32) {
    %c0_i32 = arith.constant 0 : i32
    %c0_i32_0 = arith.constant 0 : i32
    return %arg0, %arg1, %c0_i32 : i32, i32, i32
  }
  func.func @transform_6(%arg0: i32, %arg1: i32, %arg2: memref<1xf32, #tpu.memory_space<smem>>) -> (i32, i32, i32) {
    %c0_i32 = arith.constant 0 : i32
    %c0_i32_0 = arith.constant 0 : i32
    return %arg0, %arg1, %c0_i32 : i32, i32, i32
  }
}

</mosaic_0001>

<bundles_post_ra>
// kernel: scaled_dot_product_attention.1
= control target key start
LH: loop header
LB: loop body
LE: loop exit
PB: predicated region body
PF: predicated region fallthrough
CT: control target
= control target key end

     0   :  { %14 = vsyncpa [#allocation5], 0  ;;  %s1993_s0 = inlined_call_operand.<no memory space> [shape: f32[1], index: 0, kind: input, shape index: {}]   ;;  %s1994_s1 = inlined_call_operand.hbm [shape: f32[8,8,8], index: 1, kind: input, shape index: {}]   ;;  %s1995_s2 = inlined_call_operand.hbm [shape: f32[8,8,8], index: 2, kind: input, shape index: {}]   ;;  %s1996_s3 = inlined_call_operand.hbm [shape: f32[8,8,8], index: 3, kind: input, shape index: {}]   ;;  %s1997_s4 = inlined_call_operand.hbm [shape: f32[8,8,8], index: 4, kind: input, shape index: {}]   ;;  %s1998_s5 = inlined_call_operand.hbm [shape: f32[8,8,8], index: 5, kind: output, shape index: {0}]   ;;  %s1999_s6 = inlined_call_operand.hbm [shape: f32[8,8,8], index: 6, kind: output, shape index: {1}]   ;;  %s2000_s7 = inlined_call_operand.hbm [shape: f32[8,8,8], index: 7, kind: output, shape index: {2}]  }
   0x1   :  { %15 = vsyncpa [#allocation8], 0 }
   0x2   :  { %16 = vsyncpa [#allocation11], 0 }
   0x3   :  { %17 = vsyncpa [#allocation6], 0 }
   0x4   :  { %18 = vsyncpa [#allocation14], 0  ;;  %s1781_s24 = smov [#allocation7]   ;;  %s1782_s26 = smov [#allocation4]  }
   0x5   :  { %s36_s25 = sshll.u32 %s1781_s24, 4  ;;  %s24_s27 = sshll.u32 %s1782_s26, 4  ;;  %s37_s25 = int_to_ptr.vmem [resolvable:$true] %s36_s25  ;;  %s25_s27 = int_to_ptr.vmem [resolvable:$true] %s24_s27 }
   0x6   :  { %s1639_s28 = scalar_lea.vmem %s37_s25, 1024  ;;  %p1644_p1 = scmp.lt.s32.totalorder %s37_s25, %s37_s25 }
   0x7   :  { %p1640_p0 = scmp.ne.s32.totalorder %s37_s25, %s1639_s28  ;;  %p1645_p2 = scmp.lt.s32.totalorder %s1639_s28, %s1639_s28 }
   0x9   :  { %p1646_p3 = por %p1645_p2, %p1644_p1 }
   0xb   :  { %p1647_p4 = pnand %p1646_p3, %p1640_p0 }
   0xd   :  { %1650 = shalt.err (!%p1647_p4)
}
   0xe   :  { %s1783_s29 = smov 128   ;;  %s1784_s30 = smov 8  }
   0xf   :  { %42 = dma.hbm_to_vmem [thread:$0]  %s1995_s2, 1024, %s37_s25, [#allocation8], %s1783_s29, %s1783_s29, %s1784_s30  }
  0x10   :  { %s1659_s10 = scalar_lea.vmem %s25_s27, 1024  ;;  %p1664_p6 = scmp.lt.s32.totalorder %s25_s27, %s25_s27 }
  0x11   :  { %p1660_p5 = scmp.ne.s32.totalorder %s25_s27, %s1659_s10  ;;  %p1665_p7 = scmp.lt.s32.totalorder %s1659_s10, %s1659_s10 }
  0x13   :  { %p1666_p8 = por %p1665_p7, %p1664_p6 }
  0x15   :  { %p1667_p9 = pnand %p1666_p8, %p1660_p5 }
  0x17   :  { %1670 = shalt.err (!%p1667_p9)
}
  0x18   :  { %30 = dma.hbm_to_vmem [thread:$0]  %s1994_s1, 1024, %s25_s27, [#allocation5], %s1783_s29, %s1783_s29, %s1784_s30  }
  0x19   :  { %s1785_s13 = smov [#allocation9]   ;;  %s1786_s15 = smov [#allocation10]  }
  0x1a   :  { %s48_s14 = sshll.u32 %s1785_s13, 4  ;;  %s60_s16 = sshll.u32 %s1786_s15, 4  ;;  %s49_s14 = int_to_ptr.vmem [resolvable:$true] %s48_s14  ;;  %s61_s16 = int_to_ptr.vmem [resolvable:$true] %s60_s16 }
  0x1b   :  { %s1679_s2 = scalar_lea.vmem %s49_s14, 1024  ;;  %p1684_p11 = scmp.lt.s32.totalorder %s49_s14, %s49_s14 }
  0x1c   :  { %p1680_p10 = scmp.ne.s32.totalorder %s49_s14, %s1679_s2  ;;  %p1685_p12 = scmp.lt.s32.totalorder %s1679_s2, %s1679_s2 }
  0x1e   :  { %p1686_p13 = por %p1685_p12, %p1684_p11 }
  0x20   :  { %p1687_p0 = pnand %p1686_p13, %p1680_p10 }
  0x22   :  { %1690 = shalt.err (!%p1687_p0)
}
  0x23   :  { %54 = dma.hbm_to_vmem [thread:$0]  %s1996_s3, 1024, %s49_s14, [#allocation8], %s1783_s29, %s1783_s29, %s1784_s30  }
  0x24   :  { %s1699_s1 = scalar_lea.vmem %s61_s16, 1024  ;;  %p1704_p2 = scmp.lt.s32.totalorder %s61_s16, %s61_s16 }
  0x25   :  { %p1700_p1 = scmp.ne.s32.totalorder %s61_s16, %s1699_s1  ;;  %p1705_p3 = scmp.lt.s32.totalorder %s1699_s1, %s1699_s1 }
  0x27   :  { %p1706_p4 = por %p1705_p3, %p1704_p2 }
  0x29   :  { %p1707_p5 = pnand %p1706_p4, %p1700_p1 }
  0x2b   :  { %1710 = shalt.err (!%p1707_p5)
}
  0x2c   :  { %66 = dma.hbm_to_vmem [thread:$0]  %s1997_s4, 1024, %s61_s16, [#allocation11], %s1783_s29, %s1783_s29, %s1784_s30  }
  0x2d   :  { %1771 = dma.done.wait [#allocation5], 1024  }
  0x2e   :  { %1772 = vsyncadd [#allocation5], 4294966272 }
  0x2f   :  { %1773 = dma.done.wait [#allocation8], 2048  }
  0x30   :  { %1774 = vsyncadd [#allocation8], 4294965248 }
  0x31   :  { %1775 = dma.done.wait [#allocation11], 1024  }
  0x32   :  { %1776 = vsyncadd [#allocation11], 4294966272  ;;  %v1787_v0 = vmov 0.0   ;;  %vm1788_vm0 = vmmov 0   ;;  %vm104_vm1 = vcmask 64512   ;;  %v88_v1 = vld [vmem:[#allocation7] sm:$0xff]  ;;  %v689_v17 = vstv %s1993_s0 }
  0x33   :  { %1508 = vmatprep.subr.mxu0 %v1787_v0  ;;  %1510 = vmatprep.mubr.msk.f32.mxu0 %vm1788_vm0, %v1787_v0  ;;  %v80_v2 = vld [vmem:[#allocation4] sm:$0xff]  ;;  %v90_v3 = vld [vmem:[#allocation7 + $0x10] sm:$0xff]  ;;  %v89_v4 = vld [vmem:[#allocation7 + $0x8] sm:$0xff]  ;;  %s1789_s0 = smov [#allocation13]  }
  0x34   :  { %1513 = vmatprep.subr.mxu1 %v1787_v0  ;;  %1515 = vmatprep.mubr.msk.f32.mxu1 %vm1788_vm0, %v1787_v0  ;;  %v81_v5 = vld [vmem:[#allocation4 + $0x8] sm:$0xff]  ;;  %v82_v6 = vld [vmem:[#allocation4 + $0x10] sm:$0xff]  ;;  %v91_v7 = vld [vmem:[#allocation7 + $0x18] sm:$0xff]  ;;  %s1427_s21 = sshll.u32 %s1789_s0, 4  ;;  %s1428_s21 = int_to_ptr.vmem [resolvable:$true] %s1427_s21 }
  0x35   :  { %1509 = vmatpush3.msra.mxu0 %v88_v1  ;;  %1514 = vmatpush3.msra.mxu1 %v89_v4  ;;  %v83_v8 = vld [vmem:[#allocation4 + $0x18] sm:$0xff]  ;;  %v92_v9 = vld [vmem:[#allocation7 + $0x20] sm:$0xff]  ;;  %v93_v11 = vld [vmem:[#allocation7 + $0x28] sm:$0xff]  ;;  %s1711_s22 = scalar_lea.vmem %s1428_s21, 1024  ;;  %p1716_p7 = scmp.lt.s32.totalorder %s1428_s21, %s1428_s21 }
  0x36   :  { %1511 = vmatmul.mubr.msk.f32.vlgmr.msra.gmra.mxu0 %vm104_vm1, %v80_v2  ;;  %1518 = vmatprep.subr.mxu0 %v1787_v0  ;;  %v84_v10 = vld [vmem:[#allocation4 + $0x20] sm:$0xff]  ;;  %v85_v12 = vld [vmem:[#allocation4 + $0x28] sm:$0xff]  ;;  %v94_v13 = vld [vmem:[#allocation7 + $0x30] sm:$0xff]  ;;  %p1712_p6 = scmp.ne.s32.totalorder %s1428_s21, %s1711_s22  ;;  %p1717_p8 = scmp.lt.s32.totalorder %s1711_s22, %s1711_s22 }
  0x37   :  { %1519 = vmatpush3.msra.mxu0 %v90_v3  ;;  %1516 = vmatmul.mubr.msk.f32.vlgmr.msra.gmra.mxu1 %vm104_vm1, %v81_v5  ;;  %v86_v14 = vld [vmem:[#allocation4 + $0x30] sm:$0xff]  ;;  %v95_v15 = vld [vmem:[#allocation7 + $0x38] sm:$0xff]  ;;  %v698_v19 = vld [vmem:[#allocation10] sm:$0xff] }
  0x38   :  { %1520 = vmatprep.mubr.msk.f32.mxu0 %vm1788_vm0, %v1787_v0  ;;  %1523 = vmatprep.subr.mxu1 %v1787_v0  ;;  %v87_v16 = vld [vmem:[#allocation4 + $0x38] sm:$0xff]  ;;  %v699_v23 = vld [vmem:[#allocation10 + $0x8] sm:$0xff]  ;;  %v700_v27 = vld [vmem:[#allocation10 + $0x10] sm:$0xff]  ;;  %p1718_p9 = por %p1717_p8, %p1716_p7 }
  0x39   :  { %1525 = vmatprep.mubr.msk.f32.mxu1 %vm1788_vm0, %v1787_v0  ;;  %1524 = vmatpush3.msra.mxu1 %v91_v7  ;;  %v701_v34 = vld [vmem:[#allocation10 + $0x18] sm:$0xff]  ;;  %v702_v39 = vld [vmem:[#allocation10 + $0x20] sm:$0xff]  ;;  %v703_v46 = vld [vmem:[#allocation10 + $0x28] sm:$0xff] }
  0x3a   :  { %1521 = vmatmul.mubr.msk.f32.vlgmr.msra.gmra.mxu0 %vm104_vm1, %v82_v6  ;;  %1528 = vmatprep.subr.mxu0 %v1787_v0  ;;  %v704_v51 = vld [vmem:[#allocation10 + $0x30] sm:$0xff]  ;;  %v705_v57 = vld [vmem:[#allocation10 + $0x38] sm:$0xff]  ;;  %p1719_p10 = pnand %p1718_p9, %p1712_p6 }
  0x3b   :  { %1530 = vmatprep.mubr.msk.f32.mxu0 %vm1788_vm0, %v1787_v0  ;;  %1526 = vmatmul.mubr.msk.f32.vlgmr.msra.gmra.mxu1 %vm104_vm1, %v83_v8 }
  0x3c   :  { %1529 = vmatpush3.msra.mxu0 %v92_v9  ;;  %1533 = vmatprep.subr.mxu1 %v1787_v0 }
  0x3d   :  { %1535 = vmatprep.mubr.msk.f32.mxu1 %vm1788_vm0, %v1787_v0  ;;  %1534 = vmatpush3.msra.mxu1 %v93_v11 }
  0x3e   :  { %1531 = vmatmul.mubr.msk.f32.vlgmr.msra.gmra.mxu0 %vm104_vm1, %v84_v10  ;;  %1538 = vmatprep.subr.mxu0 %v1787_v0 }
  0x3f   :  { %1540 = vmatprep.mubr.msk.f32.mxu0 %vm1788_vm0, %v1787_v0  ;;  %1536 = vmatmul.mubr.msk.f32.vlgmr.msra.gmra.mxu1 %vm104_vm1, %v85_v12 }
  0x40   :  { %1539 = vmatpush3.msra.mxu0 %v94_v13  ;;  %1543 = vmatprep.subr.mxu1 %v1787_v0 }
  0x41   :  { %1545 = vmatprep.mubr.msk.f32.mxu1 %vm1788_vm0, %v1787_v0  ;;  %1544 = vmatpush3.msra.mxu1 %v95_v15 }
  0x42   :  { %1541 = vmatmul.mubr.msk.f32.vlgmr.msra.gmra.mxu0 %vm104_vm1, %v86_v14  ;;  %1548 = vmatprep.subr.mxu0 %v1787_v0 }
  0x43   :  { %1550 = vmatprep.mubr.msk.f32.mxu0 %vm1788_vm0, %v1787_v0  ;;  %1546 = vmatmul.mubr.msk.f32.vlgmr.msra.gmra.mxu1 %vm104_vm1, %v87_v16 }
  0x44   :  { %1553 = vmatprep.subr.mxu1 %v1787_v0  ;;  %1555 = vmatprep.mubr.msk.f32.mxu1 %vm1788_vm0, %v1787_v0 }
  0xf6   :  { %v174_v18 = vpop.f32.mrf.mxu0 }
  0xf7   :  { %v690_v20 = vmul.f32 %v689_v17, %v174_v18  ;;  %v247_v22 = vpop.f32.mrf.mxu1 }
  0xf8   :  { %v1512_v21 = vpop.f32.mrf.mxu0  ;;  %v691_v25 = vmul.f32 %v689_v17, %v247_v22 }
  0xf9   :  { %v706_v24 = vadd.f32 %v698_v19, %v690_v20  ;;  %v1517_v28 = vpop.f32.mrf.mxu1 }
  0xfa   :  { %v320_v26 = vpop.f32.mrf.mxu0  ;;  %v707_v29 = vadd.f32 %v699_v23, %v691_v25 }
  0xfb   :  { %714 = vst.msk [vmem:[#allocation15] sm:$0xff] %vm104_vm1, %v706_v24  ;;  %v692_v30 = vmul.f32 %v689_v17, %v320_v26  ;;  %v722_v31 = vsel %vm104_vm1, %v706_v24, -inf  ;;  %v393_v33 = vpop.f32.mrf.mxu1 }
  0xfc   :  { %723 = vmax.xlane.f32.xlu0 %v722_v31  ;;  %v1522_v32 = vpop.f32.mrf.mxu0  ;;  %715 = vst.msk [vmem:[#allocation15 + $0x8] sm:$0xff] %vm104_vm1, %v707_v29  ;;  %v693_v36 = vmul.f32 %v689_v17, %v393_v33  ;;  %v725_v37 = vsel %vm104_vm1, %v707_v29, -inf }
  0xfd   :  { %v708_v35 = vadd.f32 %v700_v27, %v692_v30  ;;  %v1527_v40 = vpop.f32.mrf.mxu1 }
  0xfe   :  { %v466_v38 = vpop.f32.mrf.mxu0  ;;  %v709_v41 = vadd.f32 %v701_v34, %v693_v36 }
  0xff   :  { %716 = vst.msk [vmem:[#allocation15 + $0x10] sm:$0xff] %vm104_vm1, %v708_v35  ;;  %v694_v42 = vmul.f32 %v689_v17, %v466_v38  ;;  %v728_v43 = vsel %vm104_vm1, %v708_v35, -inf  ;;  %v539_v45 = vpop.f32.mrf.mxu1 }
 0x100   :  { %726 = vmax.xlane.f32.xlu0 %v725_v37  ;;  %729 = vmax.xlane.f32.xlu1 %v728_v43  ;;  %v1532_v44 = vpop.f32.mrf.mxu0  ;;  %717 = vst.msk [vmem:[#allocation15 + $0x18] sm:$0xff] %vm104_vm1, %v709_v41  ;;  %v695_v48 = vmul.f32 %v689_v17, %v539_v45  ;;  %v731_v49 = vsel %vm104_vm1, %v709_v41, -inf  ;;  %v96_v43 = vld [vmem:[#allocation9] sm:$0xff] }
 0x101   :  { %v710_v47 = vadd.f32 %v702_v39, %v694_v42  ;;  %v1537_v52 = vpop.f32.mrf.mxu1  ;;  %1549 = vmatpush3.msra.mxu0 %v96_v43  ;;  %v97_v44 = vld [vmem:[#allocation9 + $0x8] sm:$0xff] }
 0x102   :  { %v612_v50 = vpop.f32.mrf.mxu0  ;;  %v711_v53 = vadd.f32 %v703_v46, %v695_v48  ;;  %1558 = vmatprep.subr.mxu0 %v1787_v0  ;;  %1554 = vmatpush3.msra.mxu1 %v97_v44 }
 0x103   :  { %718 = vst.msk [vmem:[#allocation15 + $0x20] sm:$0xff] %vm104_vm1, %v710_v47  ;;  %v696_v54 = vmul.f32 %v689_v17, %v612_v50  ;;  %v734_v55 = vsel %vm104_vm1, %v710_v47, -inf  ;;  %v685_v56 = vpop.f32.mrf.mxu1  ;;  %1563 = vmatprep.subr.mxu1 %v1787_v0 }
 0x104   :  { %732 = vmax.xlane.f32.xlu1 %v731_v49  ;;  %735 = vmax.xlane.f32.xlu0 %v734_v55  ;;  %v1542_v58 = vpop.f32.mrf.mxu0  ;;  %719 = vst.msk [vmem:[#allocation15 + $0x28] sm:$0xff] %vm104_vm1, %v711_v53  ;;  %v697_v60 = vmul.f32 %v689_v17, %v685_v56  ;;  %v737_v61 = vsel %vm104_vm1, %v711_v53, -inf }
 0x105   :  { %v712_v59 = vadd.f32 %v704_v51, %v696_v54  ;;  %v1547_v62 = vpop.f32.mrf.mxu1  ;;  %v98_v54 = vld [vmem:[#allocation9 + $0x10] sm:$0xff] }
 0x106   :  { %v713_v63 = vadd.f32 %v705_v57, %v697_v60 }
 0x107   :  { %720 = vst.msk [vmem:[#allocation15 + $0x30] sm:$0xff] %vm104_vm1, %v712_v59  ;;  %v740_v1 = vsel %vm104_vm1, %v712_v59, -inf }
 0x108   :  { %738 = vmax.xlane.f32.xlu1 %v737_v61  ;;  %741 = vmax.xlane.f32.xlu0 %v740_v1  ;;  %721 = vst.msk [vmem:[#allocation15 + $0x38] sm:$0xff] %vm104_vm1, %v713_v63  ;;  %v743_v2 = vsel %vm104_vm1, %v713_v63, -inf  ;;  %v100_v61 = vld [vmem:[#allocation9 + $0x20] sm:$0xff] }
 0x10c   :  { %744 = vmax.xlane.f32.xlu1 %v743_v2  ;;  %v101_v2 = vld [vmem:[#allocation9 + $0x28] sm:$0xff] }
 0x185   :  { %v724_v3 = vpop.xlane.xlu0 %723 }
 0x186   :  { %v746_v4 = vsub.f32 %v706_v24, %v724_v3 }
 0x188   :  { %v754_v5 = vmul.f32 1.442695, %v746_v4  ;;  %v102_v4 = vld [vmem:[#allocation9 + $0x30] sm:$0xff] }
 0x189   :  { %v727_v6 = vpop.xlane.xlu0 %726  ;;  %v730_v7 = vpop.xlane.xlu1 %729 }
 0x18a   :  { %1599 = vpow2.f32 %v754_v5  ;;  %v747_v8 = vsub.f32 %v707_v29, %v727_v6  ;;  %v748_v9 = vsub.f32 %v708_v35, %v730_v7 }
 0x18c   :  { %v756_v10 = vmul.f32 1.442695, %v747_v8  ;;  %v758_v11 = vmul.f32 1.442695, %v748_v9  ;;  %v103_v8 = vld [vmem:[#allocation9 + $0x38] sm:$0xff] }
 0x18d   :  { %v733_v12 = vpop.xlane.xlu1 %732  ;;  %v736_v13 = vpop.xlane.xlu0 %735 }
 0x18e   :  { %1601 = vpow2.f32 %v756_v10  ;;  %v749_v14 = vsub.f32 %v709_v41, %v733_v12  ;;  %v750_v15 = vsub.f32 %v710_v47, %v736_v13 }
 0x18f   :  { %1603 = vpow2.f32 %v758_v11 }
 0x190   :  { %v760_v16 = vmul.f32 1.442695, %v749_v14  ;;  %v762_v17 = vmul.f32 1.442695, %v750_v15 }
 0x191   :  { %v739_v18 = vpop.xlane.xlu1 %738  ;;  %v742_v19 = vpop.xlane.xlu0 %741 }
 0x192   :  { %1605 = vpow2.f32 %v760_v16  ;;  %v751_v20 = vsub.f32 %v711_v53, %v739_v18  ;;  %v752_v21 = vsub.f32 %v712_v59, %v742_v19  ;;  %v99_v59 = vld [vmem:[#allocation9 + $0x18] sm:$0xff] }
 0x193   :  { %1607 = vpow2.f32 %v762_v17 }
 0x194   :  { %v764_v22 = vmul.f32 1.442695, %v751_v20  ;;  %v766_v23 = vmul.f32 1.442695, %v752_v21 }
 0x195   :  { %v745_v24 = vpop.xlane.xlu1 %744 }
 0x196   :  { %1609 = vpow2.f32 %v764_v22  ;;  %v753_v25 = vsub.f32 %v713_v63, %v745_v24 }
 0x197   :  { %v1600_v26 = vpop.eup %1599  ;;  %1611 = vpow2.f32 %v766_v23 }
 0x198   :  { %v768_v27 = vmul.f32 1.442695, %v753_v25  ;;  %v770_v28 = vsel %vm104_vm1, %v1600_v26, 0.0 }
 0x199   :  { %771 = vadd.xlane.f32.xlu0 %v770_v28 }
 0x19a   :  { %1613 = vpow2.f32 %v768_v27 }
 0x19b   :  { %v1602_v29 = vpop.eup %1601 }
 0x19c   :  { %v1604_v30 = vpop.eup %1603  ;;  %v773_v31 = vsel %vm104_vm1, %v1602_v29, 0.0 }
 0x19d   :  { %774 = vadd.xlane.f32.xlu1 %v773_v31  ;;  %v776_v32 = vsel %vm104_vm1, %v1604_v30, 0.0 }
 0x19e   :  { %777 = vadd.xlane.f32.xlu0 %v776_v32 }
 0x19f   :  { %v1606_v33 = vpop.eup %1605 }
 0x1a0   :  { %v1608_v34 = vpop.eup %1607  ;;  %v779_v35 = vsel %vm104_vm1, %v1606_v33, 0.0 }
 0x1a1   :  { %780 = vadd.xlane.f32.xlu1 %v779_v35  ;;  %v782_v36 = vsel %vm104_vm1, %v1608_v34, 0.0 }
 0x1a2   :  { %783 = vadd.xlane.f32.xlu0 %v782_v36 }
 0x1a3   :  { %v1918_v37 = vpop.eup %1609 }
 0x1a4   :  { %v1920_v38 = vpop.eup %1611  ;;  %v785_v39 = vsel %vm104_vm1, %v1918_v37, 0.0 }
 0x1a5   :  { %786 = vadd.xlane.f32.xlu1 %v785_v39  ;;  %v788_v40 = vsel %vm104_vm1, %v1920_v38, 0.0 }
 0x1a6   :  { %789 = vadd.xlane.f32.xlu0 %v788_v40 }
 0x1a7   :  { %v1926_v41 = vpop.eup %1613 }
 0x1a8   :  { %v791_v42 = vsel %vm104_vm1, %v1926_v41, 0.0 }
 0x1a9   :  { %792 = vadd.xlane.f32.xlu1 %v791_v42 }
 0x222   :  { %v772_v45 = vpop.xlane.xlu0 %771 }
 0x223   :  { %1615 = vrcp.f32 %v772_v45 }
 0x226   :  { %v775_v46 = vpop.xlane.xlu1 %774 }
 0x227   :  { %1617 = vrcp.f32 %v775_v46  ;;  %v778_v47 = vpop.xlane.xlu0 %777 }
 0x228   :  { %1619 = vrcp.f32 %v778_v47 }
 0x22a   :  { %v781_v48 = vpop.xlane.xlu1 %780 }
 0x22b   :  { %1621 = vrcp.f32 %v781_v48  ;;  %v784_v49 = vpop.xlane.xlu0 %783 }
 0x22c   :  { %1623 = vrcp.f32 %v784_v49 }
 0x22e   :  { %v787_v50 = vpop.xlane.xlu1 %786 }
 0x22f   :  { %1625 = vrcp.f32 %v787_v50  ;;  %v790_v51 = vpop.xlane.xlu0 %789 }
 0x230   :  { %v1616_v52 = vpop.eup %1615  ;;  %1627 = vrcp.f32 %v790_v51 }
 0x231   :  { %v802_v53 = vmul.f32 %v1616_v52, %v1600_v26 }
 0x232   :  { %v793_v55 = vpop.xlane.xlu1 %792 }
 0x233   :  { %1629 = vrcp.f32 %v793_v55  ;;  %810 = vst.msk [vmem:[#allocation13] sm:$0xff] %vm104_vm1, %v802_v53  ;;  %1551 = vmatmul.mubr.msk.f32.vlgmr.msra.gmra.mxu0 %vm104_vm1, %v802_v53 }
 0x234   :  { %v1618_v56 = vpop.eup %1617  ;;  %1559 = vmatpush3.msra.mxu0 %v98_v54  ;;  %1560 = vmatprep.mubr.msk.f32.mxu0 %vm1788_vm0, %v1787_v0 }
 0x235   :  { %v1620_v57 = vpop.eup %1619  ;;  %v803_v58 = vmul.f32 %v1618_v56, %v1602_v29  ;;  %1568 = vmatprep.subr.mxu0 %v1787_v0 }
 0x236   :  { %v804_v60 = vmul.f32 %v1620_v57, %v1604_v30 }
 0x237   :  { %811 = vst.msk [vmem:[#allocation13 + $0x8] sm:$0xff] %vm104_vm1, %v803_v58  ;;  %1556 = vmatmul.mubr.msk.f32.vlgmr.msra.gmra.mxu1 %vm104_vm1, %v803_v58 }
 0x238   :  { %v1622_v62 = vpop.eup %1621  ;;  %812 = vst.msk [vmem:[#allocation13 + $0x10] sm:$0xff] %vm104_vm1, %v804_v60  ;;  %1561 = vmatmul.mubr.msk.f32.vlgmr.msra.gmra.mxu0 %vm104_vm1, %v804_v60  ;;  %1564 = vmatpush3.msra.mxu1 %v99_v59 }
 0x239   :  { %v1624_v63 = vpop.eup %1623  ;;  %1565 = vmatprep.mubr.msk.f32.mxu1 %vm1788_vm0, %v1787_v0  ;;  %1569 = vmatpush3.msra.mxu0 %v100_v61  ;;  %v805_v1 = vmul.f32 %v1622_v62, %v1606_v33 }
 0x23a   :  { %1570 = vmatprep.mubr.msk.f32.mxu0 %vm1788_vm0, %v1787_v0  ;;  %v806_v3 = vmul.f32 %v1624_v63, %v1608_v34  ;;  %1573 = vmatprep.subr.mxu1 %v1787_v0 }
 0x23b   :  { %813 = vst.msk [vmem:[#allocation13 + $0x18] sm:$0xff] %vm104_vm1, %v805_v1  ;;  %1566 = vmatmul.mubr.msk.f32.vlgmr.msra.gmra.mxu1 %vm104_vm1, %v805_v1  ;;  %1578 = vmatprep.subr.mxu0 %v1787_v0 }
 0x23c   :  { %v1626_v5 = vpop.eup %1625  ;;  %814 = vst.msk [vmem:[#allocation13 + $0x20] sm:$0xff] %vm104_vm1, %v806_v3  ;;  %1571 = vmatmul.mubr.msk.f32.vlgmr.msra.gmra.mxu0 %vm104_vm1, %v806_v3  ;;  %1574 = vmatpush3.msra.mxu1 %v101_v2 }
 0x23d   :  { %v1628_v6 = vpop.eup %1627  ;;  %1575 = vmatprep.mubr.msk.f32.mxu1 %vm1788_vm0, %v1787_v0  ;;  %1579 = vmatpush3.msra.mxu0 %v102_v4  ;;  %v807_v7 = vmul.f32 %v1626_v5, %v1918_v37 }
 0x23e   :  { %1580 = vmatprep.mubr.msk.f32.mxu0 %vm1788_vm0, %v1787_v0  ;;  %v808_v9 = vmul.f32 %v1628_v6, %v1920_v38  ;;  %1583 = vmatprep.subr.mxu1 %v1787_v0 }
 0x23f   :  { %815 = vst.msk [vmem:[#allocation13 + $0x28] sm:$0xff] %vm104_vm1, %v807_v7  ;;  %1576 = vmatmul.mubr.msk.f32.vlgmr.msra.gmra.mxu1 %vm104_vm1, %v807_v7 }
 0x240   :  { %v1630_v10 = vpop.eup %1629  ;;  %816 = vst.msk [vmem:[#allocation13 + $0x30] sm:$0xff] %vm104_vm1, %v808_v9  ;;  %1581 = vmatmul.mubr.msk.f32.vlgmr.msra.gmra.mxu0 %vm104_vm1, %v808_v9  ;;  %1584 = vmatpush3.msra.mxu1 %v103_v8 }
 0x241   :  { %1585 = vmatprep.mubr.msk.f32.mxu1 %vm1788_vm0, %v1787_v0  ;;  %v809_v11 = vmul.f32 %v1630_v10, %v1926_v41 }
 0x243   :  { %817 = vst.msk [vmem:[#allocation13 + $0x38] sm:$0xff] %vm104_vm1, %v809_v11  ;;  %1586 = vmatmul.mubr.msk.f32.vlgmr.msra.gmra.mxu1 %vm104_vm1, %v809_v11 }
 0x244   :  { %1722 = shalt.err (!%p1719_p10)
}
 0x245   :  { %1433 = dma.vmem_to_hbm [thread:$0]  %s1428_s21, 1024, %s1999_s6, [#allocation14], %s1783_s29, %s1783_s29, %s1784_s30  }
 0x246   :  { %s1790_s25 = smov [#allocation15]  }
 0x247   :  { %s1439_s26 = sshll.u32 %s1790_s25, 4  ;;  %s1440_s26 = int_to_ptr.vmem [resolvable:$true] %s1439_s26 }
 0x248   :  { %s1731_s27 = scalar_lea.vmem %s1440_s26, 1024  ;;  %p1736_p12 = scmp.lt.s32.totalorder %s1440_s26, %s1440_s26 }
 0x249   :  { %p1732_p11 = scmp.ne.s32.totalorder %s1440_s26, %s1731_s27  ;;  %p1737_p13 = scmp.lt.s32.totalorder %s1731_s27, %s1731_s27 }
 0x24b   :  { %p1738_p0 = por %p1737_p13, %p1736_p12 }
 0x24d   :  { %p1739_p1 = pnand %p1738_p0, %p1732_p11 }
 0x24f   :  { %1742 = shalt.err (!%p1739_p1)
}
 0x250   :  { %1445 = dma.vmem_to_hbm [thread:$0]  %s1440_s26, 1024, %s2000_s7, [#allocation14], %s1783_s29, %s1783_s29, %s1784_s30  }
 0x251   :  { %s1791_s6 = smov [#allocation12]  }
 0x252   :  { %s1415_s7 = sshll.u32 %s1791_s6, 4  ;;  %s1416_s7 = int_to_ptr.vmem [resolvable:$true] %s1415_s7 }
 0x253   :  { %s1751_s9 = scalar_lea.vmem %s1416_s7, 1024  ;;  %p1756_p3 = scmp.lt.s32.totalorder %s1416_s7, %s1416_s7 }
 0x254   :  { %p1752_p2 = scmp.ne.s32.totalorder %s1416_s7, %s1751_s9  ;;  %p1757_p4 = scmp.lt.s32.totalorder %s1751_s9, %s1751_s9 }
 0x256   :  { %p1758_p5 = por %p1757_p4, %p1756_p3 }
 0x258   :  { %p1759_p6 = pnand %p1758_p5, %p1752_p2 }
 0x2f3   :  { %v887_v0 = vpop.f32.mrf.mxu0 }
 0x2f4   :  { %1402 = vst.msk [vmem:[#allocation12] sm:$0xff] %vm104_vm1, %v887_v0 }
 0x2f5   :  { %v1552_v12 = vpop.f32.mrf.mxu0 }
 0x2f7   :  { %v960_v13 = vpop.f32.mrf.mxu1 }
 0x2f8   :  { %1403 = vst.msk [vmem:[#allocation12 + $0x8] sm:$0xff] %vm104_vm1, %v960_v13  ;;  %v1033_v14 = vpop.f32.mrf.mxu0 }
 0x2f9   :  { %1404 = vst.msk [vmem:[#allocation12 + $0x10] sm:$0xff] %vm104_vm1, %v1033_v14  ;;  %v1557_v15 = vpop.f32.mrf.mxu1 }
 0x2fa   :  { %v1562_v16 = vpop.f32.mrf.mxu0 }
 0x2fb   :  { %v1106_v17 = vpop.f32.mrf.mxu1 }
 0x2fc   :  { %1405 = vst.msk [vmem:[#allocation12 + $0x18] sm:$0xff] %vm104_vm1, %v1106_v17  ;;  %v1179_v18 = vpop.f32.mrf.mxu0 }
 0x2fd   :  { %1406 = vst.msk [vmem:[#allocation12 + $0x20] sm:$0xff] %vm104_vm1, %v1179_v18  ;;  %v1567_v19 = vpop.f32.mrf.mxu1 }
 0x2fe   :  { %v1572_v20 = vpop.f32.mrf.mxu0 }
 0x2ff   :  { %v1252_v21 = vpop.f32.mrf.mxu1 }
 0x300   :  { %1407 = vst.msk [vmem:[#allocation12 + $0x28] sm:$0xff] %vm104_vm1, %v1252_v21  ;;  %v1325_v22 = vpop.f32.mrf.mxu0 }
 0x301   :  { %1408 = vst.msk [vmem:[#allocation12 + $0x30] sm:$0xff] %vm104_vm1, %v1325_v22  ;;  %v1577_v23 = vpop.f32.mrf.mxu1 }
 0x302   :  { %v1582_v24 = vpop.f32.mrf.mxu0 }
 0x303   :  { %v1398_v25 = vpop.f32.mrf.mxu1 }
 0x304   :  { %1409 = vst.msk [vmem:[#allocation12 + $0x38] sm:$0xff] %vm104_vm1, %v1398_v25 }
 0x305   :  { %v1587_v26 = vpop.f32.mrf.mxu1 }
 0x306   :  { %1762 = shalt.err (!%p1759_p6)
}
 0x307   :  { %1421 = dma.vmem_to_hbm [thread:$0]  %s1416_s7, 1024, %s1998_s5, [#allocation6], %s1783_s29, %s1783_s29, %s1784_s30  }
 0x308   :  { %1777 = dma.done.wait [#allocation6], 1024  }
 0x309   :  { %1778 = vsyncadd [#allocation6], 4294966272 }
 0x30a   :  { %1779 = dma.done.wait [#allocation14], 2048  }
 0x30b   :  { %1780 = vsyncadd [#allocation14], 4294965248 }
 0x30c   :  { %1455 = vsyncpa [#allocation5], 1 }
 0x30d   :  { %1456 = vsyncpa [#allocation8], 1 }
 0x30e   :  { %1457 = vsyncpa [#allocation11], 1 }
 0x30f   :  { %1458 = vsyncpa [#allocation6], 1 }
 0x310   :  { %1459 = vsyncpa [#allocation14], 1 }

</bundles_post_ra>
